<compile_context>
chip_gen: v7x
topology: tpu7x:2x2x1
jax: 0.10.0
libtpu: 0.0.40
codegen_flags: <defaults>
</compile_context>

<pallas_src>
import math
from functools import partial

import jax
import jax.numpy as jnp
from jax.experimental import pallas as pl
from jax.experimental.pallas import tpu as pltpu


def _round_up(x, m):
    return ((x + m - 1) // m) * m


# ----------------------------------------------------------------------------
# Fully fused stage kernel (one grid step per batch element).
# ----------------------------------------------------------------------------
def _fused_stage_kernel(x_ref, m_ref, scale_ref, shift_ref,
                        w_in_ref, b_in_ref, wd_ref, bd_ref, w1_ref, b1_ref,
                        w_out_ref, b_out_ref,
                        logits_ref, feat_ref,
                        xp_sc,
                        *, kernel_size, num_layers, max_pad):
    T = m_ref.shape[1]
    m = m_ref[0]                                    # (T, 1) f32

    # Zero the halo buffer once.  Only the centre [max_pad:max_pad+T] is ever written
    # afterwards, so the halo stays zero => zero-padded dilated conv without jnp.pad.
    xp_sc[...] = jnp.zeros_like(xp_sc)

    # --- input 1x1 conv + mask: result becomes the resident activation ---
    y = jnp.dot(x_ref[0], w_in_ref[...], preferred_element_type=jnp.float32) + b_in_ref[...]
    xp_sc[max_pad:max_pad + T, :] = y * m

    film_scale = scale_ref[0]                       # (L, Fp) f32, (+1) already baked in
    film_shift = shift_ref[0]                       # (L, Fp) f32

    # --- residual layers (static unroll over layers, fused tap contraction) ---
    for l in range(num_layers):
        dilation = 2 ** l
        pad = (kernel_size // 2) * dilation
        taps = [
            xp_sc[max_pad - pad + k * dilation: max_pad - pad + k * dilation + T, :]
            .astype(jnp.bfloat16)
            for k in range(kernel_size)
        ]
        stacked = jnp.concatenate(taps, axis=-1)    # (T, K*Fp) bf16, lane-dense
        acc = jnp.dot(stacked, wd_ref[l], preferred_element_type=jnp.float32)  # (T, Fp) f32
        h = jnp.maximum(acc + bd_ref[l], 0.0)       # relu(conv_dilated(out))
        # ch_dropout / dropout: identity in eval mode
        h = jnp.dot(h.astype(jnp.bfloat16), w1_ref[l],
                    preferred_element_type=jnp.float32) + b1_ref[l]
        h = h * film_scale[l:l + 1, :] + film_shift[l:l + 1, :]
        # residual + mask, written back into the resident activation (no extra copy)
        xp_sc[max_pad:max_pad + T, :] = (xp_sc[max_pad:max_pad + T, :] + h) * m

    # --- output head ---
    out = xp_sc[max_pad:max_pad + T, :]
    logits = jnp.dot(out.astype(jnp.bfloat16), w_out_ref[...],
                     preferred_element_type=jnp.float32) + b_out_ref[...]
    logits_ref[0] = (logits * m).astype(logits_ref.dtype)
    feat_ref[0] = (out * m).astype(feat_ref.dtype)


def fused_stage(x, mask, scale, shift, params, *, kernel_size, num_layers):
    """x: (B,T,Cin) f32, mask: (B,T,1), scale/shift: (B,L,Fp).
    Returns lane-padded (B,T,NCp) logits and (B,T,Fp) features (pad sliced off by caller)."""
    B, T, Cin = x.shape
    Fm = params["w_in"].shape[1]
    NC = params["w_out"].shape[1]
    L, K = num_layers, kernel_size
    Fp = _round_up(Fm, 128)
    NCp = _round_up(NC, 128)
    # receptive-field halo, rounded up to a sublane multiple so the resident slab is aligned
    max_pad = _round_up((K // 2) * (2 ** (L - 1)), 8)

    bf16, f32 = jnp.bfloat16, jnp.float32
    pf, pc = Fp - Fm, NCp - NC

    # Lane-pad weights to 128 and ship all matmul operands as bf16 (halves DMA + VMEM).
    w_in = jnp.pad(params["w_in"], ((0, 0), (0, pf))).astype(bf16)               # (Cin, Fp)
    b_in = jnp.pad(params["b_in"], ((0, 0), (0, pf))).astype(f32)                # (1, Fp)
    wd = jnp.pad(params["wd"], ((0, 0), (0, 0), (0, pf), (0, pf))).astype(bf16)  # (L,K,Fp,Fp)
    wd = wd.reshape(L, K * Fp, Fp)                                               # tap-stacked
    bd = jnp.pad(params["bd"], ((0, 0), (0, 0), (0, pf))).astype(f32)            # (L,1,Fp)
    w1 = jnp.pad(params["w1"], ((0, 0), (0, pf), (0, pf))).astype(bf16)          # (L,Fp,Fp)
    b1 = jnp.pad(params["b1"], ((0, 0), (0, 0), (0, pf))).astype(f32)            # (L,1,Fp)
    w_out = jnp.pad(params["w_out"], ((0, pf), (0, pc))).astype(bf16)            # (Fp, NCp)
    b_out = jnp.pad(params["b_out"], ((0, 0), (0, pc))).astype(f32)              # (1, NCp)
    x_bf = x.astype(bf16)
    mask = mask.astype(f32)
    scale = scale.astype(f32)
    shift = shift.astype(f32)

    # Advisory cost estimate (padded dims) for XLA scheduling.
    flops = 2 * B * T * (Cin * Fp + L * (K * Fp * Fp + Fp * Fp) + Fp * NCp)
    weight_bytes = ((Cin * Fp + L * K * Fp * Fp + L * Fp * Fp + Fp * NCp) * 2
                    + (Fp + 2 * L * Fp + NCp) * 4)
    bytes_accessed = (x_bf.size * 2 + mask.size * 4 + scale.size * 4 + shift.size * 4
                      + weight_bytes + B * T * (NCp + Fp) * 4)
    cost = pl.CostEstimate(flops=int(flops), transcendentals=0,
                           bytes_accessed=int(bytes_accessed))

    # VMEM footprint estimate -> scoped limit (cap at 56 MiB so it is valid on v7x too).
    halo_bytes = (T + 2 * max_pad) * Fp * 4
    stream_bytes = (T * Cin * 2 + T * 4 + 2 * L * Fp * 4 + T * NCp * 4 + T * Fp * 4)
    need = halo_bytes + 2 * weight_bytes + 2 * stream_bytes   # double-buffered blocks
    vmem_limit = int(min(56 * 2 ** 20, max(32 * 2 ** 20, 2 * need)))

    kern = partial(_fused_stage_kernel, kernel_size=K, num_layers=L, max_pad=max_pad)
    return pl.pallas_call(
        kern,
        out_shape=(jax.ShapeDtypeStruct((B, T, NCp), jnp.float32),
                   jax.ShapeDtypeStruct((B, T, Fp), jnp.float32)),
        grid=(B,),
        in_specs=[
            pl.BlockSpec((1, T, Cin), lambda i: (i, 0, 0)),       # x (bf16)
            pl.BlockSpec((1, T, 1), lambda i: (i, 0, 0)),         # mask
            pl.BlockSpec((1, L, Fp), lambda i: (i, 0, 0)),        # FiLM scale (+1 baked in)
            pl.BlockSpec((1, L, Fp), lambda i: (i, 0, 0)),        # FiLM shift
            pl.BlockSpec((Cin, Fp), lambda i: (0, 0)),            # W_in (bf16)
            pl.BlockSpec((1, Fp), lambda i: (0, 0)),              # b_in
            pl.BlockSpec((L, K * Fp, Fp), lambda i: (0, 0, 0)),   # dilated conv W (bf16)
            pl.BlockSpec((L, 1, Fp), lambda i: (0, 0, 0)),        # dilated conv b
            pl.BlockSpec((L, Fp, Fp), lambda i: (0, 0, 0)),       # per-layer 1x1 W (bf16)
            pl.BlockSpec((L, 1, Fp), lambda i: (0, 0, 0)),        # per-layer 1x1 b
            pl.BlockSpec((Fp, NCp), lambda i: (0, 0)),            # W_out (bf16)
            pl.BlockSpec((1, NCp), lambda i: (0, 0)),             # b_out
        ],
        out_specs=(pl.BlockSpec((1, T, NCp), lambda i: (i, 0, 0)),
                   pl.BlockSpec((1, T, Fp), lambda i: (i, 0, 0))),
        scratch_shapes=[pltpu.VMEM((T + 2 * max_pad, Fp), jnp.float32)],  # resident halo buf
        compiler_params=pltpu.CompilerParams(
            dimension_semantics=("parallel",),     # batch shards across cores (keep B even on v7x)
            vmem_limit_bytes=vmem_limit),
        cost_estimate=cost,
    )(x_bf, mask, scale, shift, w_in, b_in, wd, bd, w1, b1, w_out, b_out)


# ----------------------------------------------------------------------------
# Time embedding MLP + FiLM projections (tiny; plain JAX, one stacked matmul).
# ----------------------------------------------------------------------------
def sinusoidal_pos_emb(t, dim):
    half = dim // 2
    emb = math.log(10000.0) / (half - 1)
    freqs = jnp.exp(jnp.arange(half, dtype=jnp.float32) * -emb)
    args = t.astype(jnp.float32)[:, None] * freqs[None, :]
    return jnp.concatenate([jnp.sin(args), jnp.cos(args)], axis=-1)   # (B, dim)


def time_film(t, params, *, num_layers, feat_pad):
    """Returns FiLM (scale+1, shift) stacked per layer, lane-padded: (B, L, Fp) each."""
    Fm = params["w_t1"].shape[0]
    L = num_layers
    pe = sinusoidal_pos_emb(t, Fm)
    h = jax.nn.gelu(pe @ params["w_t1"] + params["b_t1"], approximate=False)  # exact GELU
    tv = h @ params["w_t2"] + params["b_t2"]
    st = tv * jax.nn.sigmoid(tv)                                              # SiLU
    pf = feat_pad - Fm
    # (L, TD, Fm) -> (TD, L, Fp) -> one wide-N matmul
    wts = jnp.pad(jnp.transpose(params["wts"], (1, 0, 2)), ((0, 0), (0, 0), (0, pf)))
    wth = jnp.pad(jnp.transpose(params["wth"], (1, 0, 2)), ((0, 0), (0, 0), (0, pf)))
    bts = jnp.pad(params["bts"], ((0, 0), (0, 0), (0, pf)))                   # (L, 1, Fp)
    bth = jnp.pad(params["bth"], ((0, 0), (0, 0), (0, pf)))
    TD = wts.shape[0]
    scale = (st @ wts.reshape(TD, L * feat_pad)).reshape(-1, L, feat_pad)
    scale = scale + jnp.transpose(bts, (1, 0, 2)) + 1.0
    shift = (st @ wth.reshape(TD, L * feat_pad)).reshape(-1, L, feat_pad)
    shift = shift + jnp.transpose(bth, (1, 0, 2))
    return scale, shift


# ----------------------------------------------------------------------------
# Parameters + top-level forward
# ----------------------------------------------------------------------------
def init_params(key, dim, num_f_maps, num_classes, num_layers, kernel_size):
    time_dim = num_f_maps * 4
    L, K, Fm, TD = num_layers, kernel_size, num_f_maps, time_dim

    def nrm(k, shape, scale=0.05):
        return (scale * jax.random.normal(k, shape)).astype(jnp.float32)

    keys = iter(jax.random.split(key, 16))
    # Porting note: when loading trained PyTorch weights, `wts`/`bts` are the FIRST-half
    # columns of each layer's time_mlp Linear (torch.chunk -> scale), `wth`/`bth` the second.
    return {
        "w_in": nrm(next(keys), (dim, Fm)),
        "b_in": nrm(next(keys), (1, Fm)),
        "w_t1": nrm(next(keys), (Fm, TD)),
        "b_t1": nrm(next(keys), (1, TD)),
        "w_t2": nrm(next(keys), (TD, TD)),
        "b_t2": nrm(next(keys), (1, TD)),
        "w_out": nrm(next(keys), (Fm, num_classes)),
        "b_out": nrm(next(keys), (1, num_classes)),
        "wd": nrm(next(keys), (L, K, Fm, Fm)),   # dilated conv W [layer, tap, cin, cout]
        "bd": nrm(next(keys), (L, 1, Fm)),
        "w1": nrm(next(keys), (L, Fm, Fm)),
        "b1": nrm(next(keys), (L, 1, Fm)),
        "wts": nrm(next(keys), (L, TD, Fm)),     # FiLM scale weights (first chunk)
        "bts": nrm(next(keys), (L, 1, Fm)),
        "wth": nrm(next(keys), (L, TD, Fm)),     # FiLM shift weights (second chunk)
        "bth": nrm(next(keys), (L, 1, Fm)),
    }


def diff_single_stage_forward(params, x_nct, t, mask_nct, *, kernel_size, num_layers):
    """x_nct: (B, dim, T), t: (B,), mask_nct: (B, 1, T). Returns (logits, features) in NCW."""
    x = jnp.transpose(x_nct, (0, 2, 1))          # (B, T, dim)
    mask = jnp.transpose(mask_nct, (0, 2, 1))    # (B, T, 1)
    Fm = params["w_in"].shape[1]
    NC = params["w_out"].shape[1]
    Fp = _round_up(Fm, 128)

    scale, shift = time_film(t, params, num_layers=num_layers, feat_pad=Fp)  # (B, L, Fp)
    logits_p, feats_p = fused_stage(x, mask, scale, shift, params,
                                    kernel_size=kernel_size, num_layers=num_layers)
    logits = logits_p[..., :NC]
    feats = feats_p[..., :Fm]
    return jnp.transpose(logits, (0, 2, 1)), jnp.transpose(feats, (0, 2, 1))


# ----------------------------------------------------------------------------
# Pure-JAX f32 reference (for correctness check only)
# ----------------------------------------------------------------------------
def reference_forward(params, x_nct, t, mask_nct, *, kernel_size, num_layers):
    x = jnp.transpose(x_nct, (0, 2, 1))
    m = jnp.transpose(mask_nct, (0, 2, 1))
    Fm = params["w_in"].shape[1]
    out = (x @ params["w_in"] + params["b_in"]) * m
    pe = sinusoidal_pos_emb(t, Fm)
    h = jax.nn.gelu(pe @ params["w_t1"] + params["b_t1"], approximate=False)
    time = h @ params["w_t2"] + params["b_t2"]
    st = time * jax.nn.sigmoid(time)
    T = out.shape[1]
    for l in range(num_layers):
        d = 2 ** l
        pad = (kernel_size // 2) * d
        xp = jnp.pad(out, ((0, 0), (pad, pad), (0, 0)))
        acc = sum(xp[:, k * d:k * d + T, :] @ params["wd"][l, k]
                  for k in range(kernel_size)) + params["bd"][l]
        hh = jnp.maximum(acc, 0.0)
        hh = hh @ params["w1"][l] + params["b1"][l]
        scale = st @ params["wts"][l] + params["bts"][l] + 1.0
        shift = st @ params["wth"][l] + params["bth"][l]
        hh = hh * scale[:, None, :] + shift[:, None, :]
        out = (out + hh) * m
    logits = (out @ params["w_out"] + params["b_out"]) * m
    feats = out * m
    return jnp.transpose(logits, (0, 2, 1)), jnp.transpose(feats, (0, 2, 1))


if __name__ == "__main__":
    # Small shapes consistent with the module.
    B, dim, T = 2, 8, 16
    num_f_maps, num_classes = 32, 6
    num_layers, kernel_size = 3, 3

    root = jax.random.PRNGKey(0)
    k_x, k_t, k_p = jax.random.split(root, 3)

    x = jax.random.normal(k_x, (B, dim, T), dtype=jnp.float32)               # NCW
    t = jax.random.uniform(k_t, (B,), minval=0.0, maxval=1000.0, dtype=jnp.float32)
    lengths = jnp.array([T, 12], dtype=jnp.int32)                            # ragged valid lengths
    mask = (jnp.arange(T)[None, :] < lengths[:, None]).astype(jnp.float32)[:, None, :]  # (B,1,T)

    params = init_params(k_p, dim, num_f_maps, num_classes, num_layers, kernel_size)

    fwd = jax.jit(partial(diff_single_stage_forward,
                          kernel_size=kernel_size, num_layers=num_layers))
    logits, features = fwd(params, x, t, mask)
    jax.block_until_ready((logits, features))

    assert logits.shape == (B, num_classes, T)
    assert features.shape == (B, num_f_maps, T)
    assert bool(jnp.all(jnp.isfinite(logits))) and bool(jnp.all(jnp.isfinite(features)))
    # masked positions must be zeroed
    assert bool(jnp.all(logits[1, :, 12:] == 0.0)) and bool(jnp.all(features[1, :, 12:] == 0.0))

    # numerical check against a pure-JAX f32 reference (kernel uses bf16 matmul operands,
    # f32 accumulation, so tolerances are slightly loosened)
    ref_logits, ref_features = reference_forward(params, x, t, mask,
                                                 kernel_size=kernel_size,
                                                 num_layers=num_layers)
    assert bool(jnp.allclose(logits, ref_logits, atol=1e-2, rtol=1e-2))
    assert bool(jnp.allclose(features, ref_features, atol=1e-2, rtol=1e-2))

    print("KERNEL_OK")
</pallas_src>

<mosaic_0001>
module attributes {stable_mosaic.version = 11 : i64} {
  func.func @_fused_stage_kernel(%arg0: i32, %arg1: memref<1x16x8xbf16, #tpu.memory_space<vmem>>, %arg2: memref<1x16x1xf32, #tpu.memory_space<vmem>>, %arg3: memref<1x3x128xf32, #tpu.memory_space<vmem>>, %arg4: memref<1x3x128xf32, #tpu.memory_space<vmem>>, %arg5: memref<8x128xbf16, #tpu.memory_space<vmem>>, %arg6: memref<1x128xf32, #tpu.memory_space<vmem>>, %arg7: memref<3x384x128xbf16, #tpu.memory_space<vmem>>, %arg8: memref<3x1x128xf32, #tpu.memory_space<vmem>>, %arg9: memref<3x128x128xbf16, #tpu.memory_space<vmem>>, %arg10: memref<3x1x128xf32, #tpu.memory_space<vmem>>, %arg11: memref<128x128xbf16, #tpu.memory_space<vmem>>, %arg12: memref<1x128xf32, #tpu.memory_space<vmem>>, %arg13: memref<1x16x128xf32, #tpu.memory_space<vmem>>, %arg14: memref<1x16x128xf32, #tpu.memory_space<vmem>>, %arg15: memref<32x128xf32, #tpu.memory_space<vmem>>) attributes {dimension_semantics = [#tpu.dimension_semantics<parallel>], iteration_bounds = array<i64: 2>, scalar_prefetch = 0 : i64, scratch_operands = 1 : i64, tpu.core_type = #tpu.core_type<tc>, window_params = [{transform_indices = @transform_0, window_bounds = array<i64: 1, 16, 8>}, {transform_indices = @transform_1, window_bounds = array<i64: 1, 16, 1>}, {transform_indices = @transform_2, window_bounds = array<i64: 1, 3, 128>}, {transform_indices = @transform_3, window_bounds = array<i64: 1, 3, 128>}, {pipeline_mode = #tpu.pipeline_mode<synchronous>, transform_indices = @transform_4, window_bounds = array<i64: 8, 128>}, {pipeline_mode = #tpu.pipeline_mode<synchronous>, transform_indices = @transform_5, window_bounds = array<i64: 1, 128>}, {pipeline_mode = #tpu.pipeline_mode<synchronous>, transform_indices = @transform_6, window_bounds = array<i64: 3, 384, 128>}, {pipeline_mode = #tpu.pipeline_mode<synchronous>, transform_indices = @transform_7, window_bounds = array<i64: 3, 1, 128>}, {pipeline_mode = #tpu.pipeline_mode<synchronous>, transform_indices = @transform_8, window_bounds = array<i64: 3, 128, 128>}, {pipeline_mode = #tpu.pipeline_mode<synchronous>, transform_indices = @transform_9, window_bounds = array<i64: 3, 1, 128>}, {pipeline_mode = #tpu.pipeline_mode<synchronous>, transform_indices = @transform_10, window_bounds = array<i64: 128, 128>}, {pipeline_mode = #tpu.pipeline_mode<synchronous>, transform_indices = @transform_11, window_bounds = array<i64: 1, 128>}, {transform_indices = @transform_12, window_bounds = array<i64: 1, 16, 128>}, {transform_indices = @transform_13, window_bounds = array<i64: 1, 16, 128>}]} {
    %c0 = arith.constant 0 : index
    %c0_0 = arith.constant 0 : index
    %c0_1 = arith.constant 0 : index
    %0 = vector.load %arg2[%c0, %c0_0, %c0_1] : memref<1x16x1xf32, #tpu.memory_space<vmem>>, vector<1x16x1xf32>
    %1 = vector.shape_cast %0 : vector<1x16x1xf32> to vector<16x1xf32>
    %cst = arith.constant 0.000000e+00 : f32
    %2 = vector.broadcast %cst : f32 to vector<32x128xf32>
    %c0_2 = arith.constant 0 : index
    %c0_3 = arith.constant 0 : index
    %3 = vector.load %arg15[%c0_2, %c0_3] : memref<32x128xf32, #tpu.memory_space<vmem>>, vector<32x128xf32>
    tpu.vector_store %arg15[%c0_2, %c0_3], %2 {strides = array<i32>} : memref<32x128xf32, #tpu.memory_space<vmem>>, vector<32x128xf32>,
    %c0_4 = arith.constant 0 : index
    %c0_5 = arith.constant 0 : index
    %c0_6 = arith.constant 0 : index
    %4 = vector.load %arg1[%c0_4, %c0_5, %c0_6] : memref<1x16x8xbf16, #tpu.memory_space<vmem>>, vector<1x16x8xbf16>
    %5 = vector.shape_cast %4 : vector<1x16x8xbf16> to vector<16x8xbf16>
    %c0_7 = arith.constant 0 : index
    %c0_8 = arith.constant 0 : index
    %6 = vector.load %arg5[%c0_7, %c0_8] : memref<8x128xbf16, #tpu.memory_space<vmem>>, vector<8x128xbf16>
    %cst_9 = arith.constant dense<0.000000e+00> : vector<16x128xf32>
    %7 = tpu.matmul %5, %6, %cst_9 {dimension_numbers = #tpu.dot_dimension_numbers<[1], [0], [0], [1], [0, 0, 1, 1], [], []>} : vector<16x8xbf16>, vector<8x128xbf16>, vector<16x128xf32> -> vector<16x128xf32>
    %c0_10 = arith.constant 0 : index
    %c0_11 = arith.constant 0 : index
    %8 = vector.load %arg6[%c0_10, %c0_11] : memref<1x128xf32, #tpu.memory_space<vmem>>, vector<1x128xf32>
    %9 = vector.broadcast %8 : vector<1x128xf32> to vector<16x128xf32>
    %10 = arith.addf %7, %9 : vector<16x128xf32>
    %11 = vector.broadcast %1 : vector<16x1xf32> to vector<16x128xf32>
    %12 = arith.mulf %10, %11 : vector<16x128xf32>
    %c8 = arith.constant 8 : index
    %c0_12 = arith.constant 0 : index
    %13 = vector.load %arg15[%c8, %c0_12] : memref<32x128xf32, #tpu.memory_space<vmem>>, vector<16x128xf32>
    tpu.vector_store %arg15[%c8, %c0_12], %12 {strides = array<i32>} : memref<32x128xf32, #tpu.memory_space<vmem>>, vector<16x128xf32>,
    %c0_13 = arith.constant 0 : index
    %c0_14 = arith.constant 0 : index
    %c0_15 = arith.constant 0 : index
    %14 = vector.load %arg3[%c0_13, %c0_14, %c0_15] : memref<1x3x128xf32, #tpu.memory_space<vmem>>, vector<1x3x128xf32>
    %15 = vector.shape_cast %14 : vector<1x3x128xf32> to vector<3x128xf32>
    %c0_16 = arith.constant 0 : index
    %c0_17 = arith.constant 0 : index
    %c0_18 = arith.constant 0 : index
    %16 = vector.load %arg4[%c0_16, %c0_17, %c0_18] : memref<1x3x128xf32, #tpu.memory_space<vmem>>, vector<1x3x128xf32>
    %17 = vector.shape_cast %16 : vector<1x3x128xf32> to vector<3x128xf32>
    %c7 = arith.constant 7 : index
    %c0_19 = arith.constant 0 : index
    %18 = vector.load %arg15[%c7, %c0_19] : memref<32x128xf32, #tpu.memory_space<vmem>>, vector<16x128xf32>
    %19 = arith.truncf %18 : vector<16x128xf32> to vector<16x128xbf16>
    %c8_20 = arith.constant 8 : index
    %c0_21 = arith.constant 0 : index
    %20 = vector.load %arg15[%c8_20, %c0_21] : memref<32x128xf32, #tpu.memory_space<vmem>>, vector<16x128xf32>
    %21 = arith.truncf %20 : vector<16x128xf32> to vector<16x128xbf16>
    %c9 = arith.constant 9 : index
    %c0_22 = arith.constant 0 : index
    %22 = vector.load %arg15[%c9, %c0_22] : memref<32x128xf32, #tpu.memory_space<vmem>>, vector<16x128xf32>
    %23 = arith.truncf %22 : vector<16x128xf32> to vector<16x128xbf16>
    %24 = tpu.concatenate %19, %21, %23 in 1 : vector<16x128xbf16>, vector<16x128xbf16>, vector<16x128xbf16> -> vector<16x384xbf16>
    %c0_23 = arith.constant 0 : index
    %c0_24 = arith.constant 0 : index
    %c0_25 = arith.constant 0 : index
    %25 = vector.load %arg7[%c0_23, %c0_24, %c0_25] : memref<3x384x128xbf16, #tpu.memory_space<vmem>>, vector<1x384x128xbf16>
    %26 = vector.shape_cast %25 : vector<1x384x128xbf16> to vector<384x128xbf16>
    %cst_26 = arith.constant dense<0.000000e+00> : vector<16x128xf32>
    %27 = tpu.matmul %24, %26, %cst_26 {dimension_numbers = #tpu.dot_dimension_numbers<[1], [0], [0], [1], [0, 0, 1, 1], [], []>} : vector<16x384xbf16>, vector<384x128xbf16>, vector<16x128xf32> -> vector<16x128xf32>
    %c0_27 = arith.constant 0 : index
    %c0_28 = arith.constant 0 : index
    %c0_29 = arith.constant 0 : index
    %28 = vector.load %arg8[%c0_27, %c0_28, %c0_29] : memref<3x1x128xf32, #tpu.memory_space<vmem>>, vector<1x1x128xf32>
    %29 = vector.shape_cast %28 : vector<1x1x128xf32> to vector<1x128xf32>
    %30 = vector.broadcast %29 : vector<1x128xf32> to vector<16x128xf32>
    %31 = arith.addf %27, %30 : vector<16x128xf32>
    %cst_30 = arith.constant 0.000000e+00 : f32
    %32 = vector.broadcast %cst_30 : f32 to vector<16x128xf32>
    %33 = arith.maximumf %31, %32 : vector<16x128xf32>
    %34 = arith.truncf %33 : vector<16x128xf32> to vector<16x128xbf16>
    %c0_31 = arith.constant 0 : index
    %c0_32 = arith.constant 0 : index
    %c0_33 = arith.constant 0 : index
    %35 = vector.load %arg9[%c0_31, %c0_32, %c0_33] : memref<3x128x128xbf16, #tpu.memory_space<vmem>>, vector<1x128x128xbf16>
    %36 = vector.shape_cast %35 : vector<1x128x128xbf16> to vector<128x128xbf16>
    %cst_34 = arith.constant dense<0.000000e+00> : vector<16x128xf32>
    %37 = tpu.matmul %34, %36, %cst_34 {dimension_numbers = #tpu.dot_dimension_numbers<[1], [0], [0], [1], [0, 0, 1, 1], [], []>} : vector<16x128xbf16>, vector<128x128xbf16>, vector<16x128xf32> -> vector<16x128xf32>
    %c0_35 = arith.constant 0 : index
    %c0_36 = arith.constant 0 : index
    %c0_37 = arith.constant 0 : index
    %38 = vector.load %arg10[%c0_35, %c0_36, %c0_37] : memref<3x1x128xf32, #tpu.memory_space<vmem>>, vector<1x1x128xf32>
    %39 = vector.shape_cast %38 : vector<1x1x128xf32> to vector<1x128xf32>
    %40 = vector.broadcast %39 : vector<1x128xf32> to vector<16x128xf32>
    %41 = arith.addf %37, %40 : vector<16x128xf32>
    %42 = vector.extract_strided_slice %15 {offsets = [0, 0], sizes = [1, 128], strides = [1, 1]} : vector<3x128xf32> to vector<1x128xf32>
    %43 = vector.broadcast %42 : vector<1x128xf32> to vector<16x128xf32>
    %44 = arith.mulf %41, %43 : vector<16x128xf32>
    %45 = vector.extract_strided_slice %17 {offsets = [0, 0], sizes = [1, 128], strides = [1, 1]} : vector<3x128xf32> to vector<1x128xf32>
    %46 = vector.broadcast %45 : vector<1x128xf32> to vector<16x128xf32>
    %47 = arith.addf %44, %46 : vector<16x128xf32>
    %c8_38 = arith.constant 8 : index
    %c0_39 = arith.constant 0 : index
    %48 = vector.load %arg15[%c8_38, %c0_39] : memref<32x128xf32, #tpu.memory_space<vmem>>, vector<16x128xf32>
    %49 = arith.addf %48, %47 : vector<16x128xf32>
    %50 = vector.broadcast %1 : vector<16x1xf32> to vector<16x128xf32>
    %51 = arith.mulf %49, %50 : vector<16x128xf32>
    %c8_40 = arith.constant 8 : index
    %c0_41 = arith.constant 0 : index
    %52 = vector.load %arg15[%c8_40, %c0_41] : memref<32x128xf32, #tpu.memory_space<vmem>>, vector<16x128xf32>
    tpu.vector_store %arg15[%c8_40, %c0_41], %51 {strides = array<i32>} : memref<32x128xf32, #tpu.memory_space<vmem>>, vector<16x128xf32>,
    %c6 = arith.constant 6 : index
    %c0_42 = arith.constant 0 : index
    %53 = vector.load %arg15[%c6, %c0_42] : memref<32x128xf32, #tpu.memory_space<vmem>>, vector<16x128xf32>
    %54 = arith.truncf %53 : vector<16x128xf32> to vector<16x128xbf16>
    %c8_43 = arith.constant 8 : index
    %c0_44 = arith.constant 0 : index
    %55 = vector.load %arg15[%c8_43, %c0_44] : memref<32x128xf32, #tpu.memory_space<vmem>>, vector<16x128xf32>
    %56 = arith.truncf %55 : vector<16x128xf32> to vector<16x128xbf16>
    %c10 = arith.constant 10 : index
    %c0_45 = arith.constant 0 : index
    %57 = vector.load %arg15[%c10, %c0_45] : memref<32x128xf32, #tpu.memory_space<vmem>>, vector<16x128xf32>
    %58 = arith.truncf %57 : vector<16x128xf32> to vector<16x128xbf16>
    %59 = tpu.concatenate %54, %56, %58 in 1 : vector<16x128xbf16>, vector<16x128xbf16>, vector<16x128xbf16> -> vector<16x384xbf16>
    %c1 = arith.constant 1 : index
    %c0_46 = arith.constant 0 : index
    %c0_47 = arith.constant 0 : index
    %60 = vector.load %arg7[%c1, %c0_46, %c0_47] : memref<3x384x128xbf16, #tpu.memory_space<vmem>>, vector<1x384x128xbf16>
    %61 = vector.shape_cast %60 : vector<1x384x128xbf16> to vector<384x128xbf16>
    %cst_48 = arith.constant dense<0.000000e+00> : vector<16x128xf32>
    %62 = tpu.matmul %59, %61, %cst_48 {dimension_numbers = #tpu.dot_dimension_numbers<[1], [0], [0], [1], [0, 0, 1, 1], [], []>} : vector<16x384xbf16>, vector<384x128xbf16>, vector<16x128xf32> -> vector<16x128xf32>
    %c1_49 = arith.constant 1 : index
    %c0_50 = arith.constant 0 : index
    %c0_51 = arith.constant 0 : index
    %63 = vector.load %arg8[%c1_49, %c0_50, %c0_51] : memref<3x1x128xf32, #tpu.memory_space<vmem>>, vector<1x1x128xf32>
    %64 = vector.shape_cast %63 : vector<1x1x128xf32> to vector<1x128xf32>
    %65 = vector.broadcast %64 : vector<1x128xf32> to vector<16x128xf32>
    %66 = arith.addf %62, %65 : vector<16x128xf32>
    %cst_52 = arith.constant 0.000000e+00 : f32
    %67 = vector.broadcast %cst_52 : f32 to vector<16x128xf32>
    %68 = arith.maximumf %66, %67 : vector<16x128xf32>
    %69 = arith.truncf %68 : vector<16x128xf32> to vector<16x128xbf16>
    %c1_53 = arith.constant 1 : index
    %c0_54 = arith.constant 0 : index
    %c0_55 = arith.constant 0 : index
    %70 = vector.load %arg9[%c1_53, %c0_54, %c0_55] : memref<3x128x128xbf16, #tpu.memory_space<vmem>>, vector<1x128x128xbf16>
    %71 = vector.shape_cast %70 : vector<1x128x128xbf16> to vector<128x128xbf16>
    %cst_56 = arith.constant dense<0.000000e+00> : vector<16x128xf32>
    %72 = tpu.matmul %69, %71, %cst_56 {dimension_numbers = #tpu.dot_dimension_numbers<[1], [0], [0], [1], [0, 0, 1, 1], [], []>} : vector<16x128xbf16>, vector<128x128xbf16>, vector<16x128xf32> -> vector<16x128xf32>
    %c1_57 = arith.constant 1 : index
    %c0_58 = arith.constant 0 : index
    %c0_59 = arith.constant 0 : index
    %73 = vector.load %arg10[%c1_57, %c0_58, %c0_59] : memref<3x1x128xf32, #tpu.memory_space<vmem>>, vector<1x1x128xf32>
    %74 = vector.shape_cast %73 : vector<1x1x128xf32> to vector<1x128xf32>
    %75 = vector.broadcast %74 : vector<1x128xf32> to vector<16x128xf32>
    %76 = arith.addf %72, %75 : vector<16x128xf32>
    %77 = vector.extract_strided_slice %15 {offsets = [1, 0], sizes = [1, 128], strides = [1, 1]} : vector<3x128xf32> to vector<1x128xf32>
    %78 = vector.broadcast %77 : vector<1x128xf32> to vector<16x128xf32>
    %79 = arith.mulf %76, %78 : vector<16x128xf32>
    %80 = vector.extract_strided_slice %17 {offsets = [1, 0], sizes = [1, 128], strides = [1, 1]} : vector<3x128xf32> to vector<1x128xf32>
    %81 = vector.broadcast %80 : vector<1x128xf32> to vector<16x128xf32>
    %82 = arith.addf %79, %81 : vector<16x128xf32>
    %c8_60 = arith.constant 8 : index
    %c0_61 = arith.constant 0 : index
    %83 = vector.load %arg15[%c8_60, %c0_61] : memref<32x128xf32, #tpu.memory_space<vmem>>, vector<16x128xf32>
    %84 = arith.addf %83, %82 : vector<16x128xf32>
    %85 = vector.broadcast %1 : vector<16x1xf32> to vector<16x128xf32>
    %86 = arith.mulf %84, %85 : vector<16x128xf32>
    %c8_62 = arith.constant 8 : index
    %c0_63 = arith.constant 0 : index
    %87 = vector.load %arg15[%c8_62, %c0_63] : memref<32x128xf32, #tpu.memory_space<vmem>>, vector<16x128xf32>
    tpu.vector_store %arg15[%c8_62, %c0_63], %86 {strides = array<i32>} : memref<32x128xf32, #tpu.memory_space<vmem>>, vector<16x128xf32>,
    %c4 = arith.constant 4 : index
    %c0_64 = arith.constant 0 : index
    %88 = vector.load %arg15[%c4, %c0_64] : memref<32x128xf32, #tpu.memory_space<vmem>>, vector<16x128xf32>
    %89 = arith.truncf %88 : vector<16x128xf32> to vector<16x128xbf16>
    %c8_65 = arith.constant 8 : index
    %c0_66 = arith.constant 0 : index
    %90 = vector.load %arg15[%c8_65, %c0_66] : memref<32x128xf32, #tpu.memory_space<vmem>>, vector<16x128xf32>
    %91 = arith.truncf %90 : vector<16x128xf32> to vector<16x128xbf16>
    %c12 = arith.constant 12 : index
    %c0_67 = arith.constant 0 : index
    %92 = vector.load %arg15[%c12, %c0_67] : memref<32x128xf32, #tpu.memory_space<vmem>>, vector<16x128xf32>
    %93 = arith.truncf %92 : vector<16x128xf32> to vector<16x128xbf16>
    %94 = tpu.concatenate %89, %91, %93 in 1 : vector<16x128xbf16>, vector<16x128xbf16>, vector<16x128xbf16> -> vector<16x384xbf16>
    %c2 = arith.constant 2 : index
    %c0_68 = arith.constant 0 : index
    %c0_69 = arith.constant 0 : index
    %95 = vector.load %arg7[%c2, %c0_68, %c0_69] : memref<3x384x128xbf16, #tpu.memory_space<vmem>>, vector<1x384x128xbf16>
    %96 = vector.shape_cast %95 : vector<1x384x128xbf16> to vector<384x128xbf16>
    %cst_70 = arith.constant dense<0.000000e+00> : vector<16x128xf32>
    %97 = tpu.matmul %94, %96, %cst_70 {dimension_numbers = #tpu.dot_dimension_numbers<[1], [0], [0], [1], [0, 0, 1, 1], [], []>} : vector<16x384xbf16>, vector<384x128xbf16>, vector<16x128xf32> -> vector<16x128xf32>
    %c2_71 = arith.constant 2 : index
    %c0_72 = arith.constant 0 : index
    %c0_73 = arith.constant 0 : index
    %98 = vector.load %arg8[%c2_71, %c0_72, %c0_73] : memref<3x1x128xf32, #tpu.memory_space<vmem>>, vector<1x1x128xf32>
    %99 = vector.shape_cast %98 : vector<1x1x128xf32> to vector<1x128xf32>
    %100 = vector.broadcast %99 : vector<1x128xf32> to vector<16x128xf32>
    %101 = arith.addf %97, %100 : vector<16x128xf32>
    %cst_74 = arith.constant 0.000000e+00 : f32
    %102 = vector.broadcast %cst_74 : f32 to vector<16x128xf32>
    %103 = arith.maximumf %101, %102 : vector<16x128xf32>
    %104 = arith.truncf %103 : vector<16x128xf32> to vector<16x128xbf16>
    %c2_75 = arith.constant 2 : index
    %c0_76 = arith.constant 0 : index
    %c0_77 = arith.constant 0 : index
    %105 = vector.load %arg9[%c2_75, %c0_76, %c0_77] : memref<3x128x128xbf16, #tpu.memory_space<vmem>>, vector<1x128x128xbf16>
    %106 = vector.shape_cast %105 : vector<1x128x128xbf16> to vector<128x128xbf16>
    %cst_78 = arith.constant dense<0.000000e+00> : vector<16x128xf32>
    %107 = tpu.matmul %104, %106, %cst_78 {dimension_numbers = #tpu.dot_dimension_numbers<[1], [0], [0], [1], [0, 0, 1, 1], [], []>} : vector<16x128xbf16>, vector<128x128xbf16>, vector<16x128xf32> -> vector<16x128xf32>
    %c2_79 = arith.constant 2 : index
    %c0_80 = arith.constant 0 : index
    %c0_81 = arith.constant 0 : index
    %108 = vector.load %arg10[%c2_79, %c0_80, %c0_81] : memref<3x1x128xf32, #tpu.memory_space<vmem>>, vector<1x1x128xf32>
    %109 = vector.shape_cast %108 : vector<1x1x128xf32> to vector<1x128xf32>
    %110 = vector.broadcast %109 : vector<1x128xf32> to vector<16x128xf32>
    %111 = arith.addf %107, %110 : vector<16x128xf32>
    %112 = vector.extract_strided_slice %15 {offsets = [2, 0], sizes = [1, 128], strides = [1, 1]} : vector<3x128xf32> to vector<1x128xf32>
    %113 = vector.broadcast %112 : vector<1x128xf32> to vector<16x128xf32>
    %114 = arith.mulf %111, %113 : vector<16x128xf32>
    %115 = vector.extract_strided_slice %17 {offsets = [2, 0], sizes = [1, 128], strides = [1, 1]} : vector<3x128xf32> to vector<1x128xf32>
    %116 = vector.broadcast %115 : vector<1x128xf32> to vector<16x128xf32>
    %117 = arith.addf %114, %116 : vector<16x128xf32>
    %c8_82 = arith.constant 8 : index
    %c0_83 = arith.constant 0 : index
    %118 = vector.load %arg15[%c8_82, %c0_83] : memref<32x128xf32, #tpu.memory_space<vmem>>, vector<16x128xf32>
    %119 = arith.addf %118, %117 : vector<16x128xf32>
    %120 = vector.broadcast %1 : vector<16x1xf32> to vector<16x128xf32>
    %121 = arith.mulf %119, %120 : vector<16x128xf32>
    %c8_84 = arith.constant 8 : index
    %c0_85 = arith.constant 0 : index
    %122 = vector.load %arg15[%c8_84, %c0_85] : memref<32x128xf32, #tpu.memory_space<vmem>>, vector<16x128xf32>
    tpu.vector_store %arg15[%c8_84, %c0_85], %121 {strides = array<i32>} : memref<32x128xf32, #tpu.memory_space<vmem>>, vector<16x128xf32>,
    %c8_86 = arith.constant 8 : index
    %c0_87 = arith.constant 0 : index
    %123 = vector.load %arg15[%c8_86, %c0_87] : memref<32x128xf32, #tpu.memory_space<vmem>>, vector<16x128xf32>
    %124 = arith.truncf %123 : vector<16x128xf32> to vector<16x128xbf16>
    %c0_88 = arith.constant 0 : index
    %c0_89 = arith.constant 0 : index
    %125 = vector.load %arg11[%c0_88, %c0_89] : memref<128x128xbf16, #tpu.memory_space<vmem>>, vector<128x128xbf16>
    %cst_90 = arith.constant dense<0.000000e+00> : vector<16x128xf32>
    %126 = tpu.matmul %124, %125, %cst_90 {dimension_numbers = #tpu.dot_dimension_numbers<[1], [0], [0], [1], [0, 0, 1, 1], [], []>} : vector<16x128xbf16>, vector<128x128xbf16>, vector<16x128xf32> -> vector<16x128xf32>
    %c0_91 = arith.constant 0 : index
    %c0_92 = arith.constant 0 : index
    %127 = vector.load %arg12[%c0_91, %c0_92] : memref<1x128xf32, #tpu.memory_space<vmem>>, vector<1x128xf32>
    %128 = vector.broadcast %127 : vector<1x128xf32> to vector<16x128xf32>
    %129 = arith.addf %126, %128 : vector<16x128xf32>
    %130 = vector.broadcast %1 : vector<16x1xf32> to vector<16x128xf32>
    %131 = arith.mulf %129, %130 : vector<16x128xf32>
    %c0_93 = arith.constant 0 : index
    %c0_94 = arith.constant 0 : index
    %c0_95 = arith.constant 0 : index
    %132 = vector.load %arg13[%c0_93, %c0_94, %c0_95] : memref<1x16x128xf32, #tpu.memory_space<vmem>>, vector<1x16x128xf32>
    %133 = vector.shape_cast %132 : vector<1x16x128xf32> to vector<16x128xf32>
    %134 = vector.shape_cast %131 : vector<16x128xf32> to vector<1x16x128xf32>
    tpu.vector_store %arg13[%c0_93, %c0_94, %c0_95], %134 {strides = array<i32>} : memref<1x16x128xf32, #tpu.memory_space<vmem>>, vector<1x16x128xf32>,
    %135 = vector.broadcast %1 : vector<16x1xf32> to vector<16x128xf32>
    %136 = arith.mulf %123, %135 : vector<16x128xf32>
    %c0_96 = arith.constant 0 : index
    %c0_97 = arith.constant 0 : index
    %c0_98 = arith.constant 0 : index
    %137 = vector.load %arg14[%c0_96, %c0_97, %c0_98] : memref<1x16x128xf32, #tpu.memory_space<vmem>>, vector<1x16x128xf32>
    %138 = vector.shape_cast %137 : vector<1x16x128xf32> to vector<16x128xf32>
    %139 = vector.shape_cast %136 : vector<16x128xf32> to vector<1x16x128xf32>
    tpu.vector_store %arg14[%c0_96, %c0_97, %c0_98], %139 {strides = array<i32>} : memref<1x16x128xf32, #tpu.memory_space<vmem>>, vector<1x16x128xf32>,
    return
  }
  func.func @transform_0(%arg0: i32) -> (i32, i32, i32) {
    %c0_i32 = arith.constant 0 : i32
    %c0_i32_0 = arith.constant 0 : i32
    %c0_i32_1 = arith.constant 0 : i32
    return %arg0, %c0_i32, %c0_i32_0 : i32, i32, i32
  }
  func.func @transform_1(%arg0: i32) -> (i32, i32, i32) {
    %c0_i32 = arith.constant 0 : i32
    %c0_i32_0 = arith.constant 0 : i32
    %c0_i32_1 = arith.constant 0 : i32
    return %arg0, %c0_i32, %c0_i32_0 : i32, i32, i32
  }
  func.func @transform_2(%arg0: i32) -> (i32, i32, i32) {
    %c0_i32 = arith.constant 0 : i32
    %c0_i32_0 = arith.constant 0 : i32
    %c0_i32_1 = arith.constant 0 : i32
    return %arg0, %c0_i32, %c0_i32_0 : i32, i32, i32
  }
  func.func @transform_3(%arg0: i32) -> (i32, i32, i32) {
    %c0_i32 = arith.constant 0 : i32
    %c0_i32_0 = arith.constant 0 : i32
    %c0_i32_1 = arith.constant 0 : i32
    return %arg0, %c0_i32, %c0_i32_0 : i32, i32, i32
  }
  func.func @transform_4(%arg0: i32) -> (i32, i32) {
    %c0_i32 = arith.constant 0 : i32
    %c0_i32_0 = arith.constant 0 : i32
    %c0_i32_1 = arith.constant 0 : i32
    return %c0_i32, %c0_i32_0 : i32, i32
  }
  func.func @transform_5(%arg0: i32) -> (i32, i32) {
    %c0_i32 = arith.constant 0 : i32
    %c0_i32_0 = arith.constant 0 : i32
    %c0_i32_1 = arith.constant 0 : i32
    return %c0_i32, %c0_i32_0 : i32, i32
  }
  func.func @transform_6(%arg0: i32) -> (i32, i32, i32) {
    %c0_i32 = arith.constant 0 : i32
    %c0_i32_0 = arith.constant 0 : i32
    %c0_i32_1 = arith.constant 0 : i32
    %c0_i32_2 = arith.constant 0 : i32
    return %c0_i32, %c0_i32_0, %c0_i32_1 : i32, i32, i32
  }
  func.func @transform_7(%arg0: i32) -> (i32, i32, i32) {
    %c0_i32 = arith.constant 0 : i32
    %c0_i32_0 = arith.constant 0 : i32
    %c0_i32_1 = arith.constant 0 : i32
    %c0_i32_2 = arith.constant 0 : i32
    return %c0_i32, %c0_i32_0, %c0_i32_1 : i32, i32, i32
  }
  func.func @transform_8(%arg0: i32) -> (i32, i32, i32) {
    %c0_i32 = arith.constant 0 : i32
    %c0_i32_0 = arith.constant 0 : i32
    %c0_i32_1 = arith.constant 0 : i32
    %c0_i32_2 = arith.constant 0 : i32
    return %c0_i32, %c0_i32_0, %c0_i32_1 : i32, i32, i32
  }
  func.func @transform_9(%arg0: i32) -> (i32, i32, i32) {
    %c0_i32 = arith.constant 0 : i32
    %c0_i32_0 = arith.constant 0 : i32
    %c0_i32_1 = arith.constant 0 : i32
    %c0_i32_2 = arith.constant 0 : i32
    return %c0_i32, %c0_i32_0, %c0_i32_1 : i32, i32, i32
  }
  func.func @transform_10(%arg0: i32) -> (i32, i32) {
    %c0_i32 = arith.constant 0 : i32
    %c0_i32_0 = arith.constant 0 : i32
    %c0_i32_1 = arith.constant 0 : i32
    return %c0_i32, %c0_i32_0 : i32, i32
  }
  func.func @transform_11(%arg0: i32) -> (i32, i32) {
    %c0_i32 = arith.constant 0 : i32
    %c0_i32_0 = arith.constant 0 : i32
    %c0_i32_1 = arith.constant 0 : i32
    return %c0_i32, %c0_i32_0 : i32, i32
  }
  func.func @transform_12(%arg0: i32) -> (i32, i32, i32) {
    %c0_i32 = arith.constant 0 : i32
    %c0_i32_0 = arith.constant 0 : i32
    %c0_i32_1 = arith.constant 0 : i32
    return %arg0, %c0_i32, %c0_i32_0 : i32, i32, i32
  }
  func.func @transform_13(%arg0: i32) -> (i32, i32, i32) {
    %c0_i32 = arith.constant 0 : i32
    %c0_i32_0 = arith.constant 0 : i32
    %c0_i32_1 = arith.constant 0 : i32
    return %arg0, %c0_i32, %c0_i32_0 : i32, i32, i32
  }
}

</mosaic_0001>

<bundles_post_ra>
// kernel: diff_single_stage_forward.1
= control target key start
LH: loop header
LB: loop body
LE: loop exit
PB: predicated region body
PF: predicated region fallthrough
CT: control target
= control target key end

     0   :  { %s2861_s25 = smov 0   ;;  %s3378_s0 = inlined_call_operand.vmem [shape: bf16[2,16,8], index: 0, kind: input, shape index: {}]   ;;  %s3379_s1 = inlined_call_operand.vmem [shape: f32[2,16,1], index: 1, kind: input, shape index: {}]   ;;  %s3380_s2 = inlined_call_operand.vmem [shape: f32[2,3,128], index: 2, kind: input, shape index: {}]   ;;  %s3381_s3 = inlined_call_operand.vmem [shape: f32[2,3,128], index: 3, kind: input, shape index: {}]   ;;  %s3382_s4 = inlined_call_operand.vmem [shape: bf16[8,128], index: 4, kind: input, shape index: {}]   ;;  %s3383_s5 = inlined_call_operand.vmem [shape: f32[1,128], index: 5, kind: input, shape index: {}]   ;;  %s3384_s6 = inlined_call_operand.vmem [shape: bf16[3,384,128], index: 6, kind: input, shape index: {}]   ;;  %s3385_s7 = inlined_call_operand.vmem [shape: f32[3,1,128], index: 7, kind: input, shape index: {}]   ;;  %s3386_s8 = inlined_call_operand.vmem [shape: bf16[3,128,128], index: 8, kind: input, shape index: {}]   ;;  %s3387_s9 = inlined_call_operand.vmem [shape: f32[3,1,128], index: 9, kind: input, shape index: {}]   ;;  %s3388_s10 = inlined_call_operand.vmem [shape: bf16[128,128], index: 10, kind: input, shape index: {}]   ;;  %s3389_s11 = inlined_call_operand.vmem [shape: f32[1,128], index: 11, kind: input, shape index: {}]   ;;  %s3390_s12 = inlined_call_operand.vmem [shape: f32[2,16,128], index: 12, kind: output, shape index: {0}]   ;;  %s3391_s13 = inlined_call_operand.vmem [shape: f32[2,16,128], index: 13, kind: output, shape index: {1}]  }
   0x1 LB: > { %s2118_s26 = sadd.s32 4294967295, %s2786_s25   ;;  %p2122_p0 = scmp.ge.s32.totalorder %s2786_s25, 1  ;;  %s2786_s25 = sphi %s2861_s25, %s24_s25  }
   0x2   : > { %p418_p1 = scmp.lt.s32.totalorder %s2786_s25, 3 }
   0x4   : > { %p419_p2 = pnand %p2122_p0, %p418_p1 }
   0x5   : > { %v517_v0 = vld [vmem:[%s3382_s4] sm:$0xf] (!%p419_p2)  ;;  %vm534_vm0 = vcmask (!%p419_p2), 1043456   ;;  %p480_p3 = scmp.lt.s32.totalorder (!%p419_p2), %s2118_s26, 1  ;;  %v2788_v1 = vmov (!%p419_p2), 0.0   ;;  %vm2789_vm1 = vmmov (!%p419_p2), 0  }
   0x6   : > { %422 = sbr.rel (%p419_p2) target bundleno = 1835 (0x72b), region = 68  ;;  %2516 = vmatprep.subr.bf16.mxu0 (!%p419_p2), %v2788_v1  ;;  %511 = vst [vmem:[#allocation2] sm:$0xff] (!%p419_p2), %v2788_v1  ;;  %514 = vst [vmem:[#allocation2 + $0x18] sm:$0xff] (!%p419_p2), %v2788_v1  ;;  %v536_v2 = vsel (!%p419_p2), %vm534_vm0, %v517_v0, 0  ;;  %2518 = vmatprep.mubr.msk.bf16.mxu0 (!%p419_p2), %vm2789_vm1, %v2788_v1  ;;  %v2675_v3 = vld [vmem:[%s3384_s6 + $0x40] sm:$0xff] (!%p419_p2)   ;;  %vm530_vm2 = vcmask (!%p419_p2), 64512  }
   0x7   : > { %2517 = vmatpush3.bf16.msra.mxu0 (!%p419_p2), %v536_v2  ;;  %v2790_v4 = vmov (!%p419_p2), 0   ;;  %2387 = vmatprep.subr.bf16.mxu1 (!%p419_p2), %v2675_v3  ;;  %v2676_v5 = vld [vmem:[%s3384_s6 + $0x80] sm:$0xff] (!%p419_p2)   ;;  %v2678_v7 = vld [vmem:[%s3384_s6 + $0x48] sm:$0xff] (!%p419_p2)   ;;  %v2681_v13 = vld [vmem:[%s3384_s6 + $0x50] sm:$0xff] (!%p419_p2)  }
   0x8   : > { %2673 = vset.pattern.permute.xlu0 (!%p419_p2), %v2790_v4  ;;  %2522 = vmatprep.subr.bf16.mxu0 (!%p419_p2), %v2788_v1  ;;  %v2677_v6 = vld [vmem:[%s3384_s6] sm:$0xff] (!%p419_p2)   ;;  %v2679_v11 = vld [vmem:[%s3384_s6 + $0x88] sm:$0xff] (!%p419_p2)   ;;  %v2683_v14 = vld [vmem:[%s3384_s6 + $0x10] sm:$0xff] (!%p419_p2)  }
   0x9   : > { %2388 = vmatpush3.bf16.msra.mxu1 (!%p419_p2), %v2677_v6  ;;  %v2680_v12 = vld [vmem:[%s3384_s6 + $0x8] sm:$0xff] (!%p419_p2)   ;;  %v2684_v15 = vld [vmem:[%s3384_s6 + $0x58] sm:$0xff] (!%p419_p2)   ;;  %v2682_v16 = vld [vmem:[%s3384_s6 + $0x90] sm:$0xff] (!%p419_p2)  }
   0xa   : > { %2389 = vmatprep.subr.bf16.mxu1 (!%p419_p2), %v2678_v7  ;;  %v2686_v17 = vld [vmem:[%s3384_s6 + $0x18] sm:$0xff] (!%p419_p2)   ;;  %v2687_v19 = vld [vmem:[%s3384_s6 + $0x60] sm:$0xff] (!%p419_p2)   ;;  %v2690_v22 = vld [vmem:[%s3384_s6 + $0x68] sm:$0xff] (!%p419_p2)  }
   0xb   : > { %v2685_v18 = vld [vmem:[%s3384_s6 + $0x98] sm:$0xff] (!%p419_p2)   ;;  %v2688_v20 = vld [vmem:[%s3384_s6 + $0xa0] sm:$0xff] (!%p419_p2)   ;;  %v2691_v23 = vld [vmem:[%s3384_s6 + $0xa8] sm:$0xff] (!%p419_p2)  }
   0xc   : > { %v2689_v21 = vld [vmem:[%s3384_s6 + $0x20] sm:$0xff] (!%p419_p2)   ;;  %v2692_v24 = vld [vmem:[%s3384_s6 + $0x28] sm:$0xff] (!%p419_p2)   ;;  %v2693_v25 = vld [vmem:[%s3384_s6 + $0x70] sm:$0xff] (!%p419_p2)  }
   0xd   : > { %s3393_s26 = smov (!%p480_p3, %s2118_s26), 1  ;;  %2390 = vmatpush3.bf16.msra.mxu1 %v2680_v12  ;;  %v2694_v26 = vld [vmem:[%s3384_s6 + $0xb0] sm:$0xff]   ;;  %v2696_v28 = vld [vmem:[%s3384_s6 + $0x78] sm:$0xff]   ;;  %v2133_v32 = vld [vmem:[%s3383_s5] ss:$0 sm:$0xff] }
   0xe   : > { %s2381_s16 = sshll.u32 %s3393_s26, 3  ;;  %s2888_s17 = sshll.u32 %s3393_s26, 4  ;;  %2391 = vmatprep.subr.bf16.mxu1 %v2681_v13  ;;  %v2695_v27 = vld [vmem:[%s3384_s6 + $0x30] sm:$0xff]   ;;  %v2697_v29 = vld [vmem:[%s3384_s6 + $0xb8] sm:$0xff]   ;;  %v2699_v44 = vld [vmem:[%s3386_s8] sm:$0xff]  }
   0xf   : > { %s484_s24 = scalar_lea.vmem %s3378_s0, %s2381_s16  ;;  %s489_s29 = scalar_lea.vmem %s3379_s1, %s2888_s17  ;;  %v2698_v30 = vld [vmem:[%s3384_s6 + $0x38] sm:$0xff]   ;;  %v2700_v50 = vld [vmem:[%s3386_s8 + $0x8] sm:$0xff]   ;;  %v2701_v51 = vld [vmem:[%s3386_s8 + $0x10] sm:$0xff]  }
  0x10   : > { %v2674_v8 = vld [vmem:[%s484_s24] sm:$0xff]   ;;  %v510_v10 = vld [vmem:[%s489_s29 + $0x8] sm:$0xff]  ;;  %v2702_v52 = vld [vmem:[%s3386_s8 + $0x18] sm:$0xff]   ;;  %s2127_s24 = sshll.u32 %s3393_s26, 2  ;;  %s507_s19 = scalar_lea.vmem %s3391_s13, %s2888_s17 }
  0x11   : > { %v509_v9 = vld [vmem:[%s489_s29] sm:$0xff]  ;;  %2519 = vmatmul.mubr.msk.bf16.vlgmr.msra.gmra.mrb[0].mxu0 %vm530_vm2, %v2674_v8  ;;  %2392 = vmatpush3.bf16.msra.mxu1 %v2683_v14  ;;  %v2704_v54 = vld [vmem:[%s3386_s8 + $0x28] sm:$0xff]   ;;  %v2705_v55 = vld [vmem:[%s3386_s8 + $0x30] sm:$0xff]   ;;  %s493_s29 = scalar_lea.vmem %s3380_s2, %s2127_s24  ;;  %s497_s15 = scalar_lea.vmem %s3381_s3, %s2127_s24 }
  0x12   : > { %581 = vperm.xlu0 %2673, %v509_v9   ;;  %2523 = vmatpush3.bf16.msra.mxu0 %v2676_v5  ;;  %v2703_v53 = vld [vmem:[%s3386_s8 + $0x20] sm:$0xff]   ;;  %v2706_v56 = vld [vmem:[%s3386_s8 + $0x38] sm:$0xff]   ;;  %v2710_v59 = vld [vmem:[%s3384_s6 + $0x108] sm:$0xff]   ;;  %s502_s24 = scalar_lea.vmem %s3390_s12, %s2888_s17 }
  0x13   : > { %2538 = vmatprep.mubr.msk.bf16.mxu0 %vm2789_vm1, %v2788_v1  ;;  %2524 = vmatprep.subr.bf16.mxu0 %v2788_v1  ;;  %v2707_v57 = vld [vmem:[%s3384_s6 + $0x100] sm:$0xff]   ;;  %v2712_v60 = vld [vmem:[%s3384_s6 + $0xc8] sm:$0xff]  }
  0x14   : > { %2393 = vmatprep.subr.bf16.mxu1 %v2684_v15  ;;  %v2709_v58 = vld [vmem:[%s3384_s6 + $0xc0] sm:$0xff]  }
  0x15   : > { %2394 = vmatpush3.bf16.msra.mxu1 %v2686_v17  ;;  %v2136_v0 = vld [vmem:[%s3385_s7] ss:$0 sm:$0xff]  ;;  %v2711_v17 = vld [vmem:[%s3384_s6 + $0x148] sm:$0xff]  }
  0x16   : > { %586 = vperm.xlu0 %2673, %v510_v10   ;;  %2525 = vmatpush3.bf16.msra.mxu0 %v2679_v11  ;;  %v2708_v15 = vld [vmem:[%s3384_s6 + $0x140] sm:$0xff]  }
  0x17   : > { %2526 = vmatprep.subr.bf16.mxu0 %v2788_v1  ;;  %2395 = vmatprep.subr.bf16.mxu1 %v2687_v19  ;;  %v2714_v19 = vld [vmem:[%s3384_s6 + $0x150] sm:$0xff]  }
  0x19   : > { %2396 = vmatpush3.bf16.msra.mxu1 %v2689_v21  ;;  %v2716_v21 = vld [vmem:[%s3384_s6 + $0x118] sm:$0xff]  }
  0x1a   : > { %2527 = vmatpush3.bf16.msra.mxu0 %v2682_v16  ;;  %2397 = vmatprep.subr.bf16.mxu1 %v2690_v22  ;;  %v2717_v22 = vld [vmem:[%s3384_s6 + $0x158] sm:$0xff]  }
  0x1b   : > { %2528 = vmatprep.subr.bf16.mxu0 %v2788_v1 }
  0x1d   : > { %2398 = vmatpush3.bf16.msra.mxu1 %v2692_v24  ;;  %v2719_v24 = vld [vmem:[%s3384_s6 + $0x120] sm:$0xff]  }
  0x1e   : > { %2529 = vmatpush3.bf16.msra.mxu0 %v2685_v18  ;;  %2399 = vmatprep.subr.bf16.mxu1 %v2693_v25  ;;  %v2713_v18 = vld [vmem:[%s3384_s6 + $0x110] sm:$0xff]   ;;  %v2720_v25 = vld [vmem:[%s3384_s6 + $0x160] sm:$0xff]  }
  0x1f   : > { %2530 = vmatprep.subr.bf16.mxu0 %v2788_v1 }
  0x21   : > { %2400 = vmatpush3.bf16.msra.mxu1 %v2695_v27  ;;  %v2722_v27 = vld [vmem:[%s3384_s6 + $0x128] sm:$0xff]  }
  0x22   : > { %2531 = vmatpush3.bf16.msra.mxu0 %v2688_v20  ;;  %2401 = vmatprep.subr.bf16.mxu1 %v2696_v28  ;;  %v2715_v20 = vld [vmem:[%s3384_s6 + $0xd0] sm:$0xff]   ;;  %v2723_v28 = vld [vmem:[%s3384_s6 + $0x168] sm:$0xff]  }
  0x23   : > { %2532 = vmatprep.subr.bf16.mxu0 %v2788_v1 }
  0x25   : > { %2402 = vmatpush3.bf16.msra.mxu1 %v2698_v30  ;;  %v2725_v30 = vld [vmem:[%s3384_s6 + $0x130] sm:$0xff]  }
  0x26   : > { %2533 = vmatpush3.bf16.msra.mxu0 %v2691_v23  ;;  %2542 = vmatprep.subr.bf16.mxu1 %v2788_v1  ;;  %v2718_v23 = vld [vmem:[%s3384_s6 + $0xd8] sm:$0xff]  }
  0x27   : > { %2534 = vmatprep.subr.bf16.mxu0 %v2788_v1 }
  0x2a   : > { %2535 = vmatpush3.bf16.msra.mxu0 %v2694_v26  ;;  %v2721_v26 = vld [vmem:[%s3384_s6 + $0xe0] sm:$0xff]  }
  0x2b   : > { %2536 = vmatprep.subr.bf16.mxu0 %v2788_v1 }
  0x2e   : > { %2537 = vmatpush3.bf16.msra.mxu0 %v2697_v29  ;;  %v2724_v29 = vld [vmem:[%s3384_s6 + $0xe8] sm:$0xff]  }
  0x2f   : > { %2427 = vmatprep.subr.bf16.mxu0 %v2707_v57 }
  0x91   : > { %v2974_v31 = vpop.permute.xlu0 %581 }
  0x95   : > { %v2982_v40 = vpop.permute.xlu0 %586 }
  0xe4   : > { %v572_v33 = vpop.f32.mrb[0].mxu0 }
  0xe5   : > { %v573_v34 = vadd.f32 %v2133_v32, %v572_v33  ;;  %v2520_v35 = vpop.f32.mrb[1].mxu0  ;;  %v2727_v33 = vld [vmem:[%s3384_s6 + $0xf0] sm:$0xff]  }
  0xe6   : > { %v575_v36 = vpop.f32.mrb[2].mxu0  ;;  %v2729_v35 = vld [vmem:[%s3384_s6 + $0x178] sm:$0xff]  }
  0xe7   : > { %v2980_v37 = vmul.f32 %v2974_v31, %v573_v34  ;;  %v576_v38 = vadd.f32 %v2133_v32, %v575_v36  ;;  %v2521_v39 = vpop.f32.mrb[3].mxu0  ;;  %v2726_v32 = vld [vmem:[%s3384_s6 + $0x170] sm:$0xff]   ;;  %v2728_v34 = vld [vmem:[%s3384_s6 + $0x138] sm:$0xff]  }
  0xe8   : > { %v2730_v36 = vld [vmem:[%s3384_s6 + $0xf8] sm:$0xff]  }
  0xe9   : > { %591 = vst [vmem:[#allocation2 + $0x8] sm:$0xff] %v2980_v37  ;;  %v2986_v41 = vmul.f32 %v2982_v40, %v576_v38  ;;  %v1000_v38 = vlaneseq }
  0xeb   : > { %592 = vst [vmem:[#allocation2 + $0x10] sm:$0xff] %v2986_v41  ;;  %v600_v42 = vpack.c.bf16 %v2986_v41, %v2980_v37  ;;  %v3111_v39 = vshrl.u32 %v1000_v38, 7  ;;  %v2745_v38 = vld [vmem:[%s3384_s6 + $0x1d0] sm:$0xff]  }
  0xed   : > { %835 = vmatprep.mubr.bf16.mxu1 %v600_v42  ;;  %v1002_v42 = vsub.s32 0, %v3111_v39 }
  0xf0   : > { %v595_v43 = vld [vmem:[#allocation2 + $0x7] sm:$0xff] }
  0xf2   : > { %v601_v45 = vld [vmem:[#allocation2 + $0x9] sm:$0xff]  ;;  %v602_v46 = vld [vmem:[#allocation2 + $0x11] sm:$0xff] }
  0xf3   : > { %v596_v47 = vld [vmem:[#allocation2 + $0xf] sm:$0xff]  ;;  %v603_v48 = vpack.c.bf16 %v602_v46, %v601_v45  ;;  %v2161_v45 = vld [vmem:[%s3387_s9] ss:$0 sm:$0xff] }
  0xf4   : > { %v597_v49 = vpack.c.bf16 %v596_v47, %v595_v43  ;;  %v3120_v43 = vld [vmem:[%s493_s29] sm:$0x7] }
  0xf5   : > { %2539 = vmatmul.mubr.bf16.vlgmr.msra.gmra.mrb[4].mxu0 %v603_v48  ;;  %v1003_v46 = vrot.slane %v3120_v43, %v1002_v42 }
  0xf6   : > { %836 = vmatmul.mubr.bf16.vlgmr.msra.gmra.mrb[0].mxu1 %v597_v49  ;;  %2428 = vmatpush3.bf16.msra.mxu0 %v2709_v58 }
  0xf7   : > { %2543 = vmatpush3.bf16.msra.mxu1 %v2699_v44  ;;  %2558 = vmatprep.mubr.msk.bf16.mxu1 %vm2789_vm1, %v2788_v1  ;;  %v3122_v44 = vld [vmem:[%s497_s15] sm:$0x7] }
  0xf8   : > { %2544 = vmatprep.subr.bf16.mxu1 %v2788_v1  ;;  %2429 = vmatprep.subr.bf16.mxu0 %v2710_v59  ;;  %v1009_v49 = vrot.slane %v3122_v44, %v1002_v42  ;;  %v2746_v42 = vld [vmem:[%s3384_s6 + $0x210] sm:$0xff]  }
  0xfa   : > { %2430 = vmatpush3.bf16.msra.mxu0 %v2712_v60 }
  0xfb   : > { %2545 = vmatpush3.bf16.msra.mxu1 %v2700_v50  ;;  %2431 = vmatprep.subr.bf16.mxu0 %v2713_v18 }
  0xfc   : > { %2546 = vmatprep.subr.bf16.mxu1 %v2788_v1 }
  0xfe   : > { %2432 = vmatpush3.bf16.msra.mxu0 %v2715_v20 }
  0xff   : > { %2547 = vmatpush3.bf16.msra.mxu1 %v2701_v51  ;;  %2433 = vmatprep.subr.bf16.mxu0 %v2716_v21 }
 0x100   : > { %2548 = vmatprep.subr.bf16.mxu1 %v2788_v1 }
 0x102   : > { %2434 = vmatpush3.bf16.msra.mxu0 %v2718_v23 }
 0x103   : > { %2549 = vmatpush3.bf16.msra.mxu1 %v2702_v52  ;;  %2435 = vmatprep.subr.bf16.mxu0 %v2719_v24 }
 0x104   : > { %2550 = vmatprep.subr.bf16.mxu1 %v2788_v1 }
 0x106   : > { %2436 = vmatpush3.bf16.msra.mxu0 %v2721_v26 }
 0x107   : > { %2551 = vmatpush3.bf16.msra.mxu1 %v2703_v53  ;;  %2437 = vmatprep.subr.bf16.mxu0 %v2722_v27 }
 0x108   : > { %2552 = vmatprep.subr.bf16.mxu1 %v2788_v1 }
 0x10a   : > { %2438 = vmatpush3.bf16.msra.mxu0 %v2724_v29 }
 0x10b   : > { %2553 = vmatpush3.bf16.msra.mxu1 %v2704_v54  ;;  %2439 = vmatprep.subr.bf16.mxu0 %v2725_v30 }
 0x10c   : > { %2554 = vmatprep.subr.bf16.mxu1 %v2788_v1 }
 0x10e   : > { %2440 = vmatpush3.bf16.msra.mxu0 %v2727_v33 }
 0x10f   : > { %2555 = vmatpush3.bf16.msra.mxu1 %v2705_v55  ;;  %2441 = vmatprep.subr.bf16.mxu0 %v2728_v34  ;;  %v2740_v34 = vld [vmem:[%s3384_s6 + $0x200] sm:$0xff]  }
 0x110   : > { %2556 = vmatprep.subr.bf16.mxu1 %v2788_v1 }
 0x112   : > { %2442 = vmatpush3.bf16.msra.mxu0 %v2730_v36  ;;  %v2743_v36 = vld [vmem:[%s3384_s6 + $0x208] sm:$0xff]  }
 0x113   : > { %2557 = vmatpush3.bf16.msra.mxu1 %v2706_v56  ;;  %2582 = vmatprep.subr.bf16.mxu0 %v2788_v1 }
 0x114   : > { %2562 = vmatprep.subr.bf16.mxu1 %v2788_v1 }
 0x1c8   : > { %v878_v61 = vpop.f32.mrb[4].mxu0 }
 0x1c9   : > { %v2403_v62 = vpop.f32.mrb[0].mxu1  ;;  %v2540_v63 = vpop.f32.mrb[5].mxu0 }
 0x1ca   : > { %v2404_v2 = vpop.f32.mrb[1].mxu1  ;;  %v881_v4 = vpop.f32.mrb[6].mxu0 }
 0x1cb   : > { %v2405_v3 = vadd.f32 %v2404_v2, %v2403_v62  ;;  %v2406_v5 = vpop.f32.mrb[2].mxu1  ;;  %v2541_v6 = vpop.f32.mrb[7].mxu0 }
 0x1cc   : > { %v2407_v7 = vpop.f32.mrb[3].mxu1  ;;  %v2733_v6 = vld [vmem:[%s3386_s8 + $0x50] sm:$0xff]  }
 0x1cd   : > { %v838_v8 = vadd.f32 %v2405_v3, %v2136_v0  ;;  %v2408_v9 = vadd.f32 %v2407_v7, %v2406_v5  ;;  %v2732_v5 = vld [vmem:[%s3386_s8 + $0x48] sm:$0xff]   ;;  %v2734_v7 = vld [vmem:[%s3386_s8 + $0x58] sm:$0xff]  }
 0x1cf   : > { %v879_v10 = vadd.f32 %v878_v61, %v838_v8  ;;  %v841_v11 = vadd.f32 %v2408_v9, %v2136_v0  ;;  %v2735_v8 = vld [vmem:[%s3386_s8 + $0x60] sm:$0xff]   ;;  %v2736_v9 = vld [vmem:[%s3386_s8 + $0x68] sm:$0xff]  }
 0x1d1   : > { %v882_v12 = vadd.f32 %v881_v4, %v841_v11  ;;  %v885_v13 = vmax.f32 %v879_v10, 0.0  ;;  %v2737_v10 = vld [vmem:[%s3386_s8 + $0x70] sm:$0xff]   ;;  %v2738_v11 = vld [vmem:[%s3386_s8 + $0x78] sm:$0xff]  }
 0x1d3   : > { %v886_v14 = vmax.f32 %v882_v12, 0.0  ;;  %v2739_v12 = vld [vmem:[%s3384_s6 + $0x1c0] sm:$0xff]  }
 0x1d5   : > { %v887_v16 = vpack.c.bf16 %v886_v14, %v885_v13  ;;  %v2741_v13 = vld [vmem:[%s3384_s6 + $0x180] sm:$0xff]   ;;  %v2742_v14 = vld [vmem:[%s3384_s6 + $0x1c8] sm:$0xff]  }
 0x1d7   : > { %2559 = vmatmul.mubr.bf16.vlgmr.msra.gmra.mrb[4].mxu1 %v887_v16 }
 0x1d8   : > { %2563 = vmatpush3.bf16.msra.mxu1 %v2708_v15  ;;  %2578 = vmatprep.mubr.msk.bf16.mxu1 %vm2789_vm1, %v2788_v1  ;;  %v2744_v15 = vld [vmem:[%s3384_s6 + $0x188] sm:$0xff]  }
 0x1d9   : > { %2564 = vmatprep.subr.bf16.mxu1 %v2788_v1 }
 0x1dc   : > { %2565 = vmatpush3.bf16.msra.mxu1 %v2711_v17 }
 0x1dd   : > { %2566 = vmatprep.subr.bf16.mxu1 %v2788_v1 }
 0x1e0   : > { %2567 = vmatpush3.bf16.msra.mxu1 %v2714_v19  ;;  %v2219_v19 = vld [vmem:[%s3385_s7 + $0x1] ss:$0 sm:$0xff] }
 0x1e1   : > { %2568 = vmatprep.subr.bf16.mxu1 %v2788_v1 }
 0x1e4   : > { %2569 = vmatpush3.bf16.msra.mxu1 %v2717_v22 }
 0x1e5   : > { %2570 = vmatprep.subr.bf16.mxu1 %v2788_v1 }
 0x1e8   : > { %2571 = vmatpush3.bf16.msra.mxu1 %v2720_v25 }
 0x1e9   : > { %2572 = vmatprep.subr.bf16.mxu1 %v2788_v1 }
 0x1ec   : > { %2573 = vmatpush3.bf16.msra.mxu1 %v2723_v28 }
 0x1ed   : > { %2574 = vmatprep.subr.bf16.mxu1 %v2788_v1 }
 0x1f0   : > { %2575 = vmatpush3.bf16.msra.mxu1 %v2726_v32 }
 0x1f1   : > { %2576 = vmatprep.subr.bf16.mxu1 %v2788_v1 }
 0x1f4   : > { %2577 = vmatpush3.bf16.msra.mxu1 %v2729_v35 }
 0x1f5   : > { %2467 = vmatprep.subr.bf16.mxu1 %v2739_v12 }
 0x2aa   : > { %v993_v47 = vpop.f32.mrb[4].mxu1 }
 0x2ab   : > { %v994_v48 = vadd.f32 %v2161_v45, %v993_v47  ;;  %v2560_v50 = vpop.f32.mrb[5].mxu1  ;;  %v2749_v47 = vld [vmem:[%s3384_s6 + $0x218] sm:$0xff]  }
 0x2ac   : > { %v996_v51 = vpop.f32.mrb[6].mxu1  ;;  %v2752_v50 = vld [vmem:[%s3384_s6 + $0x220] sm:$0xff]  }
 0x2ad   : > { %v1004_v52 = vmul.f32 %v1003_v46, %v994_v48  ;;  %v997_v53 = vadd.f32 %v2161_v45, %v996_v51  ;;  %v2561_v54 = vpop.f32.mrb[7].mxu1  ;;  %v2747_v45 = vld [vmem:[%s3384_s6 + $0x190] sm:$0xff]   ;;  %v2750_v48 = vld [vmem:[%s3384_s6 + $0x198] sm:$0xff]   ;;  %v2753_v51 = vld [vmem:[%s3384_s6 + $0x1a0] sm:$0xff]  }
 0x2ae   : > { %v2756_v54 = vld [vmem:[%s3384_s6 + $0x1a8] sm:$0xff]  }
 0x2af   : > { %v1010_v55 = vadd.f32 %v1009_v49, %v1004_v52  ;;  %v1005_v56 = vmul.f32 %v1003_v46, %v997_v53  ;;  %v3209_v46 = vld [vmem:[#allocation2] sm:$0xff]  ;;  %v2754_v52 = vld [vmem:[%s3384_s6 + $0x1e8] sm:$0xff]  }
 0x2b0   : > { %v2755_v53 = vld [vmem:[%s3384_s6 + $0x228] sm:$0xff]  }
 0x2b1   : > { %v1012_v57 = vadd.f32 %v1010_v55, %v2980_v37  ;;  %v1011_v58 = vadd.f32 %v1009_v49, %v1005_v56  ;;  %v2731_v37 = vld [vmem:[%s3386_s8 + $0x40] sm:$0xff]   ;;  %v2757_v55 = vld [vmem:[%s3384_s6 + $0x1f0] sm:$0xff]  }
 0x2b2   : > { %v2751_v49 = vld [vmem:[%s3384_s6 + $0x1e0] sm:$0xff]   ;;  %v2758_v56 = vld [vmem:[%s3384_s6 + $0x230] sm:$0xff]  }
 0x2b3   : > { %v3131_v59 = vmul.f32 %v1012_v57, %v2974_v31  ;;  %v1013_v60 = vadd.f32 %v1011_v58, %v2986_v41  ;;  %v2759_v57 = vld [vmem:[%s3384_s6 + $0x1b0] sm:$0xff]   ;;  %v2760_v58 = vld [vmem:[%s3384_s6 + $0x1f8] sm:$0xff]  }
 0x2b5   : > { %1016 = vst [vmem:[#allocation2 + $0x8] sm:$0xff] %v3131_v59  ;;  %v3136_v61 = vmul.f32 %v1013_v60, %v2982_v40  ;;  %v2761_v60 = vld [vmem:[%s3384_s6 + $0x238] sm:$0xff]  }
 0x2b7   : > { %1017 = vst [vmem:[#allocation2 + $0x10] sm:$0xff] %v3136_v61  ;;  %v1023_v62 = vpack.c.bf16 %v3136_v61, %v3131_v59 }
 0x2b9   : > { %1260 = vmatprep.mubr.bf16.mxu0 %v1023_v62  ;;  %v2762_v62 = vld [vmem:[%s3384_s6 + $0x1b8] sm:$0xff]  }
 0x2bc   : > { %v1018_v63 = vld [vmem:[#allocation2 + $0x6] sm:$0xff] }
 0x2be   : > { %v1024_v0 = vld [vmem:[#allocation2 + $0xa] sm:$0xff]  ;;  %v1025_v2 = vld [vmem:[#allocation2 + $0x12] sm:$0xff] }
 0x2bf   : > { %v1019_v3 = vld [vmem:[#allocation2 + $0xe] sm:$0xff]  ;;  %v1026_v41 = vpack.c.bf16 %v1025_v2, %v1024_v0 }
 0x2c0   : > { %v1020_v4 = vpack.c.bf16 %v1019_v3, %v1018_v63  ;;  %v1429_v63 = vsub.s32 1, %v3111_v39 }
 0x2c1   : > { %2579 = vmatmul.mubr.bf16.vlgmr.msra.gmra.mrb[8].mxu1 %v1026_v41 }
 0x2c2   : > { %1261 = vmatmul.mubr.bf16.vlgmr.msra.gmra.mrb[8].mxu0 %v1020_v4  ;;  %2468 = vmatpush3.bf16.msra.mxu1 %v2741_v13  ;;  %v1430_v0 = vrot.slane %v3120_v43, %v1429_v63  ;;  %v1436_v41 = vrot.slane %v3122_v44, %v1429_v63  ;;  %v1855_v63 = vsub.s32 2, %v3111_v39 }
 0x2c3   : > { %2583 = vmatpush3.bf16.msra.mxu0 %v2731_v37  ;;  %2598 = vmatprep.mubr.msk.bf16.mxu0 %vm2789_vm1, %v2788_v1  ;;  %v2261_v37 = vld [vmem:[%s3387_s9 + $0x1] ss:$0 sm:$0xff] }
 0x2c4   : > { %2584 = vmatprep.subr.bf16.mxu0 %v2788_v1  ;;  %2469 = vmatprep.subr.bf16.mxu1 %v2742_v14 }
 0x2c6   : > { %2470 = vmatpush3.bf16.msra.mxu1 %v2744_v15 }
 0x2c7   : > { %2585 = vmatpush3.bf16.msra.mxu0 %v2732_v5  ;;  %2471 = vmatprep.subr.bf16.mxu1 %v2745_v38 }
 0x2c8   : > { %2586 = vmatprep.subr.bf16.mxu0 %v2788_v1 }
 0x2ca   : > { %2472 = vmatpush3.bf16.msra.mxu1 %v2747_v45 }
 0x2cb   : > { %2587 = vmatpush3.bf16.msra.mxu0 %v2733_v6 }
 0x2cc   : > { %2588 = vmatprep.subr.bf16.mxu0 %v2788_v1 }
 0x2cf   : > { %2589 = vmatpush3.bf16.msra.mxu0 %v2734_v7 }
 0x2d0   : > { %2590 = vmatprep.subr.bf16.mxu0 %v2788_v1 }
 0x2d3   : > { %2591 = vmatpush3.bf16.msra.mxu0 %v2735_v8 }
 0x2d4   : > { %2592 = vmatprep.subr.bf16.mxu0 %v2788_v1 }
 0x2d7   : > { %2593 = vmatpush3.bf16.msra.mxu0 %v2736_v9 }
 0x2d8   : > { %2594 = vmatprep.subr.bf16.mxu0 %v2788_v1 }
 0x2db   : > { %2595 = vmatpush3.bf16.msra.mxu0 %v2737_v10 }
 0x2dc   : > { %2596 = vmatprep.subr.bf16.mxu0 %v2788_v1 }
 0x2df   : > { %2597 = vmatpush3.bf16.msra.mxu0 %v2738_v11 }
 0x2e0   : > { %2602 = vmatprep.subr.bf16.mxu0 %v2788_v1 }
 0x394   : > { %v1303_v16 = vpop.f32.mrb[8].mxu1 }
 0x395   : > { %v2443_v17 = vpop.f32.mrb[8].mxu0  ;;  %v2580_v18 = vpop.f32.mrb[9].mxu1 }
 0x396   : > { %v2444_v20 = vpop.f32.mrb[9].mxu0  ;;  %v1306_v22 = vpop.f32.mrb[10].mxu1 }
 0x397   : > { %v2445_v21 = vadd.f32 %v2444_v20, %v2443_v17  ;;  %v2446_v23 = vpop.f32.mrb[10].mxu0  ;;  %v2581_v24 = vpop.f32.mrb[11].mxu1 }
 0x398   : > { %v2447_v25 = vpop.f32.mrb[11].mxu0  ;;  %v2767_v24 = vld [vmem:[%s3386_s8 + $0xa0] sm:$0xff]  }
 0x399   : > { %v1263_v26 = vadd.f32 %v2445_v21, %v2219_v19  ;;  %v2448_v27 = vadd.f32 %v2447_v25, %v2446_v23  ;;  %v2764_v21 = vld [vmem:[%s3386_s8 + $0x88] sm:$0xff]   ;;  %v2766_v23 = vld [vmem:[%s3386_s8 + $0x98] sm:$0xff]  }
 0x39a   : > { %v2768_v25 = vld [vmem:[%s3386_s8 + $0xa8] sm:$0xff]  }
 0x39b   : > { %v1304_v28 = vadd.f32 %v1303_v16, %v1263_v26  ;;  %v1266_v29 = vadd.f32 %v2448_v27, %v2219_v19  ;;  %v2769_v26 = vld [vmem:[%s3386_s8 + $0xb0] sm:$0xff]   ;;  %v2770_v27 = vld [vmem:[%s3386_s8 + $0xb8] sm:$0xff]  }
 0x39d   : > { %v1307_v30 = vadd.f32 %v1306_v22, %v1266_v29  ;;  %v1310_v32 = vmax.f32 %v1304_v28, 0.0  ;;  %v2765_v22 = vld [vmem:[%s3386_s8 + $0x90] sm:$0xff]   ;;  %v2771_v28 = vld [vmem:[%s3388_s10] sm:$0xff]   ;;  %v2772_v29 = vld [vmem:[%s3388_s10 + $0x8] sm:$0xff]  }
 0x39f   : > { %v1311_v33 = vmax.f32 %v1307_v30, 0.0 }
 0x3a1   : > { %v1312_v35 = vpack.c.bf16 %v1311_v33, %v1310_v32 }
 0x3a3   : > { %2599 = vmatmul.mubr.bf16.vlgmr.msra.gmra.mrb[12].mxu0 %v1312_v35 }
 0x3a4   : > { %2603 = vmatpush3.bf16.msra.mxu0 %v2740_v34  ;;  %2618 = vmatprep.mubr.msk.bf16.mxu0 %vm2789_vm1, %v2788_v1  ;;  %v2319_v34 = vld [vmem:[%s3385_s7 + $0x2] ss:$0 sm:$0xff] }
 0x3a5   : > { %2604 = vmatprep.subr.bf16.mxu0 %v2788_v1 }
 0x3a8   : > { %2605 = vmatpush3.bf16.msra.mxu0 %v2743_v36 }
 0x3a9   : > { %2606 = vmatprep.subr.bf16.mxu0 %v2788_v1  ;;  %v2748_v1 = vld [vmem:[%s3384_s6 + $0x1d8] sm:$0xff]  }
 0x3aa   : > { %2473 = vmatprep.subr.bf16.mxu1 %v2748_v1 }
 0x3ab   : > { %2474 = vmatpush3.bf16.msra.mxu1 %v2750_v48 }
 0x3ac   : > { %2607 = vmatpush3.bf16.msra.mxu0 %v2746_v42  ;;  %2475 = vmatprep.subr.bf16.mxu1 %v2751_v49 }
 0x3ad   : > { %2608 = vmatprep.subr.bf16.mxu0 %v3209_v46 }
 0x3af   : > { %2476 = vmatpush3.bf16.msra.mxu1 %v2753_v51 }
 0x3b0   : > { %2609 = vmatpush3.bf16.msra.mxu0 %v2749_v47  ;;  %2477 = vmatprep.subr.bf16.mxu1 %v2754_v52 }
 0x3b1   : > { %2610 = vmatprep.subr.bf16.mxu0 %v3209_v46 }
 0x3b3   : > { %2478 = vmatpush3.bf16.msra.mxu1 %v2756_v54 }
 0x3b4   : > { %2611 = vmatpush3.bf16.msra.mxu0 %v2752_v50  ;;  %2479 = vmatprep.subr.bf16.mxu1 %v2757_v55  ;;  %v2773_v55 = vld [vmem:[%s3388_s10 + $0x10] sm:$0xff]  }
 0x3b5   : > { %2612 = vmatprep.subr.bf16.mxu0 %v3209_v46 }
 0x3b7   : > { %2480 = vmatpush3.bf16.msra.mxu1 %v2759_v57  ;;  %v2775_v57 = vld [vmem:[%s3388_s10 + $0x20] sm:$0xff]  }
 0x3b8   : > { %2613 = vmatpush3.bf16.msra.mxu0 %v2755_v53  ;;  %2481 = vmatprep.subr.bf16.mxu1 %v2760_v58  ;;  %v2776_v58 = vld [vmem:[%s3388_s10 + $0x28] sm:$0xff]  }
 0x3b9   : > { %2614 = vmatprep.subr.bf16.mxu0 %v3209_v46 }
 0x3bb   : > { %2482 = vmatpush3.bf16.msra.mxu1 %v2762_v62  ;;  %v2778_v62 = vld [vmem:[%s3388_s10 + $0x38] sm:$0xff]  }
 0x3bc   : > { %2615 = vmatpush3.bf16.msra.mxu0 %v2758_v56  ;;  %2622 = vmatprep.subr.bf16.mxu1 %v3209_v46  ;;  %v2774_v56 = vld [vmem:[%s3388_s10 + $0x18] sm:$0xff]  }
 0x3bd   : > { %2616 = vmatprep.subr.bf16.mxu0 %v3209_v46 }
 0x3c0   : > { %2617 = vmatpush3.bf16.msra.mxu0 %v2761_v60  ;;  %v2777_v60 = vld [vmem:[%s3388_s10 + $0x30] sm:$0xff]  }
 0x3c1   : > { %2642 = vmatprep.subr.bf16.mxu0 %v3209_v46 }
 0x476   : > { %v1420_v2 = vpop.f32.mrb[12].mxu0 }
 0x477   : > { %v1421_v3 = vadd.f32 %v2261_v37, %v1420_v2  ;;  %v2600_v4 = vpop.f32.mrb[13].mxu0 }
 0x478   : > { %v1423_v5 = vpop.f32.mrb[14].mxu0 }
 0x479   : > { %v1431_v6 = vmul.f32 %v1430_v0, %v1421_v3  ;;  %v1424_v7 = vadd.f32 %v2261_v37, %v1423_v5  ;;  %v2601_v8 = vpop.f32.mrb[15].mxu0  ;;  %v2361_v37 = vld [vmem:[%s3387_s9 + $0x2] ss:$0 sm:$0xff] }
 0x47b   : > { %v1437_v9 = vadd.f32 %v1436_v41, %v1431_v6  ;;  %v1432_v10 = vmul.f32 %v1430_v0, %v1424_v7  ;;  %v1856_v0 = vrot.slane %v3120_v43, %v1855_v63 }
 0x47d   : > { %v1439_v11 = vadd.f32 %v1437_v9, %v3131_v59  ;;  %v1438_v12 = vadd.f32 %v1436_v41, %v1432_v10  ;;  %v2763_v59 = vld [vmem:[%s3386_s8 + $0x80] sm:$0xff]   ;;  %v1862_v41 = vrot.slane %v3122_v44, %v1855_v63 }
 0x47f   : > { %v3271_v13 = vmul.f32 %v1439_v11, %v2974_v31  ;;  %v1440_v14 = vadd.f32 %v1438_v12, %v3136_v61 }
 0x481   : > { %1443 = vst [vmem:[#allocation2 + $0x8] sm:$0xff] %v3271_v13  ;;  %v3276_v15 = vmul.f32 %v1440_v14, %v2982_v40 }
 0x483   : > { %1444 = vst [vmem:[#allocation2 + $0x10] sm:$0xff] %v3276_v15  ;;  %v1450_v16 = vpack.c.bf16 %v3276_v15, %v3271_v13 }
 0x485   : > { %1686 = vmatprep.mubr.bf16.mxu1 %v1450_v16 }
 0x488   : > { %v1445_v19 = vld [vmem:[#allocation2 + $0x4] sm:$0xff] }
 0x48a   : > { %v1446_v17 = vld [vmem:[#allocation2 + $0xc] sm:$0xff]  ;;  %v1451_v18 = vld [vmem:[#allocation2 + $0x14] sm:$0xff] }
 0x48b   : > { %v1452_v20 = vpack.c.bf16 %v1451_v18, %v1446_v17  ;;  %v1447_v61 = vpack.c.bf16 %v1446_v17, %v1445_v19 }
 0x48d   : > { %2619 = vmatmul.mubr.bf16.vlgmr.msra.gmra.mrb[16].mxu0 %v1452_v20  ;;  %1687 = vmatmul.mubr.bf16.vlgmr.msra.gmra.mrb[12].mxu1 %v1447_v61 }
 0x48e   : > { %2623 = vmatpush3.bf16.msra.mxu1 %v2763_v59  ;;  %2638 = vmatprep.mubr.msk.bf16.mxu1 %vm2789_vm1, %v3209_v46 }
 0x48f   : > { %2624 = vmatprep.subr.bf16.mxu1 %v3209_v46  ;;  %2658 = vmatprep.mubr.msk.bf16.mxu0 %vm2789_vm1, %v3209_v46 }
 0x490   : > { %2643 = vmatpush3.bf16.msra.mxu0 %v2771_v28 }
 0x491   : > { %2644 = vmatprep.subr.bf16.mxu0 %v3209_v46 }
 0x492   : > { %2625 = vmatpush3.bf16.msra.mxu1 %v2764_v21 }
 0x493   : > { %2626 = vmatprep.subr.bf16.mxu1 %v3209_v46 }
 0x494   : > { %2645 = vmatpush3.bf16.msra.mxu0 %v2772_v29 }
 0x495   : > { %2646 = vmatprep.subr.bf16.mxu0 %v3209_v46 }
 0x496   : > { %2627 = vmatpush3.bf16.msra.mxu1 %v2765_v22 }
 0x497   : > { %2628 = vmatprep.subr.bf16.mxu1 %v3209_v46 }
 0x498   : > { %2647 = vmatpush3.bf16.msra.mxu0 %v2773_v55 }
 0x499   : > { %2648 = vmatprep.subr.bf16.mxu0 %v3209_v46 }
 0x49a   : > { %2629 = vmatpush3.bf16.msra.mxu1 %v2766_v23 }
 0x49b   : > { %2630 = vmatprep.subr.bf16.mxu1 %v3209_v46 }
 0x49c   : > { %2649 = vmatpush3.bf16.msra.mxu0 %v2774_v56 }
 0x49d   : > { %2650 = vmatprep.subr.bf16.mxu0 %v3209_v46 }
 0x49e   : > { %2631 = vmatpush3.bf16.msra.mxu1 %v2767_v24 }
 0x49f   : > { %2632 = vmatprep.subr.bf16.mxu1 %v3209_v46 }
 0x4a0   : > { %2651 = vmatpush3.bf16.msra.mxu0 %v2775_v57 }
 0x4a1   : > { %2652 = vmatprep.subr.bf16.mxu0 %v3209_v46 }
 0x4a2   : > { %2633 = vmatpush3.bf16.msra.mxu1 %v2768_v25 }
 0x4a3   : > { %2634 = vmatprep.subr.bf16.mxu1 %v3209_v46 }
 0x4a4   : > { %2653 = vmatpush3.bf16.msra.mxu0 %v2776_v58 }
 0x4a5   : > { %2654 = vmatprep.subr.bf16.mxu0 %v3209_v46 }
 0x4a6   : > { %2635 = vmatpush3.bf16.msra.mxu1 %v2769_v26 }
 0x4a7   : > { %2636 = vmatprep.subr.bf16.mxu1 %v3209_v46 }
 0x4a8   : > { %2655 = vmatpush3.bf16.msra.mxu0 %v2777_v60 }
 0x4a9   : > { %2656 = vmatprep.subr.bf16.mxu0 %v3209_v46 }
 0x4aa   : > { %2637 = vmatpush3.bf16.msra.mxu1 %v2770_v27 }
 0x4ac   : > { %2657 = vmatpush3.bf16.msra.mxu0 %v2778_v62 }
 0x560   : > { %v1729_v30 = vpop.f32.mrb[16].mxu0  ;;  %v2483_v32 = vpop.f32.mrb[12].mxu1 }
 0x561   : > { %v2620_v33 = vpop.f32.mrb[17].mxu0  ;;  %v2484_v35 = vpop.f32.mrb[13].mxu1 }
 0x562   : > { %v2485_v36 = vadd.f32 %v2484_v35, %v2483_v32  ;;  %v1732_v38 = vpop.f32.mrb[18].mxu0  ;;  %v2486_v42 = vpop.f32.mrb[14].mxu1 }
 0x563   : > { %v2621_v45 = vpop.f32.mrb[19].mxu0  ;;  %v2487_v1 = vpop.f32.mrb[15].mxu1 }
 0x564   : > { %v1689_v47 = vadd.f32 %v2485_v36, %v2319_v34  ;;  %v2488_v48 = vadd.f32 %v2487_v1, %v2486_v42 }
 0x566   : > { %v1730_v49 = vadd.f32 %v1729_v30, %v1689_v47  ;;  %v1692_v50 = vadd.f32 %v2488_v48, %v2319_v34 }
 0x568   : > { %v1733_v51 = vadd.f32 %v1732_v38, %v1692_v50  ;;  %v1736_v52 = vmax.f32 %v1730_v49, 0.0 }
 0x56a   : > { %v1737_v53 = vmax.f32 %v1733_v51, 0.0 }
 0x56c   : > { %v1738_v54 = vpack.c.bf16 %v1737_v53, %v1736_v52 }
 0x56e   : > { %2639 = vmatmul.mubr.bf16.vlgmr.msra.gmra.mrb[16].mxu1 %v1738_v54 }
 0x641   : > { %v1846_v2 = vpop.f32.mrb[16].mxu1 }
 0x642   : > { %v1847_v3 = vadd.f32 %v2361_v37, %v1846_v2  ;;  %v2640_v4 = vpop.f32.mrb[17].mxu1 }
 0x643   : > { %v1849_v46 = vpop.f32.mrb[18].mxu1 }
 0x644   : > { %v1857_v5 = vmul.f32 %v1856_v0, %v1847_v3  ;;  %v1850_v6 = vadd.f32 %v2361_v37, %v1849_v46  ;;  %v2641_v7 = vpop.f32.mrb[19].mxu1 }
 0x646   : > { %v1863_v8 = vadd.f32 %v1862_v41, %v1857_v5  ;;  %v1858_v9 = vmul.f32 %v1856_v0, %v1850_v6 }
 0x648   : > { %v1865_v39 = vadd.f32 %v1863_v8, %v3271_v13  ;;  %v1864_v10 = vadd.f32 %v1862_v41, %v1858_v9  ;;  %v2370_v13 = vld [vmem:[%s3389_s11] ss:$0 sm:$0xff] }
 0x64a   : > { %v1867_v11 = vmul.f32 %v1865_v39, %v2974_v31  ;;  %v1866_v12 = vadd.f32 %v1864_v10, %v3276_v15 }
 0x64c   : > { %1869 = vst [vmem:[#allocation2 + $0x8] sm:$0xff] %v1867_v11  ;;  %v1868_v43 = vmul.f32 %v1866_v12, %v2982_v40  ;;  %v1990_v44 = vmul.f32 %v1867_v11, %v2974_v31 }
 0x64e   : > { %1870 = vst [vmem:[#allocation2 + $0x10] sm:$0xff] %v1868_v43  ;;  %v1873_v14 = vpack.c.bf16 %v1868_v43, %v1867_v11  ;;  %v1991_v16 = vmul.f32 %v1868_v43, %v2982_v40  ;;  %1992 = vst [vmem:[%s507_s19] sm:$0xff] %v1990_v44 }
 0x650   : > { %2659 = vmatmul.mubr.bf16.vlgmr.msra.gmra.mrb[20].mxu0 %v1873_v14  ;;  %1993 = vst [vmem:[%s507_s19 + $0x8] sm:$0xff] %v1991_v16 }
 0x723   : > { %v1979_v15 = vpop.f32.mrb[20].mxu0 }
 0x724   : > { %v1980_v59 = vadd.f32 %v2370_v13, %v1979_v15  ;;  %v2660_v17 = vpop.f32.mrb[21].mxu0 }
 0x725   : > { %v1982_v18 = vpop.f32.mrb[22].mxu0 }
 0x726   : > { %v1986_v19 = vmul.f32 %v1980_v59, %v2974_v31  ;;  %v1983_v20 = vadd.f32 %v2370_v13, %v1982_v18  ;;  %v2661_v61 = vpop.f32.mrb[23].mxu0 }
 0x728   : > { %1988 = vst [vmem:[%s502_s24] sm:$0xff] %v1986_v19  ;;  %v1987_v21 = vmul.f32 %v1983_v20, %v2982_v40 }
 0x72a   : > { %1989 = vst [vmem:[%s502_s24 + $0x8] sm:$0xff] %v1987_v21 }
 0x72b PF: > { %s24_s25 = sadd.s32 1, %s2786_s25  }
 0x72c   : > { %p21_p4 = scmp.ge.s32.totalorder %s24_s25, 4  }
 0x72e   :  { %23 = sbr.rel (!%p21_p4) target bundleno = 1 (0x1), region = 127 }

</bundles_post_ra>
